<compile_context>
chip_gen: v6e
topology: v6e:2x2x1
jax: 0.10.0
libtpu: 0.0.40
codegen_flags: <defaults>
</compile_context>

<pallas_src>
import functools

import jax
import jax.numpy as jnp
from jax.experimental import pallas as pl
from jax.experimental.pallas import tpu as pltpu

_LANE = 128


def _channel_gate_kernel(x_ref, w1_ref, b1_ref, w2_ref, b2_ref,
                         gamma_ref, beta_ref, o_ref, acc_ref,
                         *, eps, inv_hw, n_chunks):
    # x_ref:   (b, c, TILE_HW)  current spatial tile (auto double-buffered)
    # w1_ref:  (c, hid)   w2_ref: (hid, c)
    # b1_ref:  (1, hid)   b2_ref/gamma_ref/beta_ref: (1, c)
    # o_ref:   (b, c)     acc_ref: (b, c, 128) lane-shaped partial-sum scratch
    k = pl.program_id(0)

    @pl.when(k == 0)
    def _init():
        acc_ref[...] = jnp.zeros_like(acc_ref)

    # Partial pooled SUM for this tile: accumulate 128-lane-aligned slices with
    # pure VPU adds (static slices = zero-cost ref views). The cross-lane (XLU)
    # reduce happens exactly once, in the finalize step.
    part = x_ref[:, :, 0:_LANE]
    for i in range(1, n_chunks):
        part = part + x_ref[:, :, i * _LANE:(i + 1) * _LANE]
    acc_ref[...] += part

    @pl.when(k == pl.num_programs(0) - 1)
    def _finalize():
        # Global average pool: single cross-lane reduce + single divide.
        y = jnp.sum(acc_ref[...], axis=-1) * inv_hw                 # (b, c)

        # MLP: Linear -> ReLU -> Linear (MXU matmuls, f32 accumulation).
        h = jnp.dot(y, w1_ref[...], preferred_element_type=jnp.float32)
        h = jnp.maximum(h + b1_ref[...], 0.0)                       # (b, hid)
        z = jnp.dot(h, w2_ref[...], preferred_element_type=jnp.float32)
        z = z + b2_ref[...]                                         # (b, c)

        # BatchNorm1d (training mode): biased batch statistics over batch dim.
        mu = jnp.mean(z, axis=0, keepdims=True)                     # (1, c)
        var = jnp.mean((z - mu) * (z - mu), axis=0, keepdims=True)  # (1, c)
        z_hat = (z - mu) * jax.lax.rsqrt(var + eps)
        o_ref[...] = z_hat * gamma_ref[...] + beta_ref[...]         # (b, c)


def _pick_tile_hw(b, c, hw):
    """Spatial tile: multiple of 128 lanes, ~4 MiB per input block (VMEM-safe
    with double-buffering on v5e/v6e/v7x), capped so the unrolled add chain
    stays short."""
    bytes_per_lane = b * c * 4
    tile = (4 * 1024 * 1024) // max(bytes_per_lane, 1)
    tile = max(_LANE, (tile // _LANE) * _LANE)
    tile = min(tile, 4096)
    hw_pad128 = pl.cdiv(hw, _LANE) * _LANE
    return min(tile, hw_pad128)


def channel_gate_scores(x, w1, b1, w2, b2, gamma, beta, *, eps=1e-5):
    """Returns the (b, c) gate (pre-broadcast).

    Prefer consuming this directly (e.g. fusing the eventual x * gate) so XLA
    never has to materialize a full (b, c, h, w) broadcast in HBM.
    """
    b, c, h, w = x.shape
    hid = w1.shape[0]
    hw = h * w

    tile = _pick_tile_hw(b, c, hw)
    hw_pad = pl.cdiv(hw, tile) * tile
    n_tiles = hw_pad // tile
    n_chunks = tile // _LANE

    x_flat = x.reshape(b, c, hw)
    if hw_pad != hw:
        # Zero padding is exact: we accumulate SUMs per tile and divide by the
        # true h*w exactly once in the finalize step.
        x_flat = jnp.pad(x_flat, ((0, 0), (0, 0), (0, hw_pad - hw)))

    # Glue: pre-transpose Linear weights to (in, out), lift 1-D params to rows.
    w1_t = jnp.transpose(w1)            # (c, hid)
    w2_t = jnp.transpose(w2)            # (hid, c)
    b1_r = b1.reshape(1, hid)
    b2_r = b2.reshape(1, c)
    gamma_r = gamma.reshape(1, c)
    beta_r = beta.reshape(1, c)

    in_bytes = b * c * hw_pad * 4
    param_bytes = 4 * (2 * c * hid + hid + 3 * c)
    cost = pl.CostEstimate(
        flops=2 * b * c * hw + 4 * b * c * hid + 10 * b * c,
        transcendentals=0,
        bytes_accessed=in_bytes + param_bytes + b * c * 4,
    )

    block_bytes = b * c * tile * 4
    acc_bytes = b * c * _LANE * 4
    vmem_limit = int(min(
        max(2 * block_bytes + acc_bytes + param_bytes + (4 << 20), 16 << 20),
        48 << 20))

    grid_spec = pltpu.PrefetchScalarGridSpec(
        num_scalar_prefetch=0,
        grid=(n_tiles,),
        in_specs=[
            pl.BlockSpec((b, c, tile), lambda k: (0, 0, k)),   # streamed input
            pl.BlockSpec((c, hid), lambda k: (0, 0)),          # resident params
            pl.BlockSpec((1, hid), lambda k: (0, 0)),
            pl.BlockSpec((hid, c), lambda k: (0, 0)),
            pl.BlockSpec((1, c), lambda k: (0, 0)),
            pl.BlockSpec((1, c), lambda k: (0, 0)),
            pl.BlockSpec((1, c), lambda k: (0, 0)),
        ],
        out_specs=pl.BlockSpec((b, c), lambda k: (0, 0)),      # resident output
        scratch_shapes=[pltpu.VMEM((b, c, _LANE), jnp.float32)],
    )

    gate = pl.pallas_call(
        functools.partial(_channel_gate_kernel, eps=eps, inv_hw=1.0 / hw,
                          n_chunks=n_chunks),
        out_shape=jax.ShapeDtypeStruct((b, c), jnp.float32),
        grid_spec=grid_spec,
        compiler_params=pltpu.CompilerParams(
            dimension_semantics=("arbitrary",),   # spatial reduction axis
            vmem_limit_bytes=vmem_limit,
        ),
        cost_estimate=cost,
    )(x_flat, w1_t, b1_r, w2_t, b2_r, gamma_r, beta_r)
    return gate


def channel_gate(x, w1, b1, w2, b2, gamma, beta, *, eps=1e-5):
    """x: (b, c, h, w) float32. Returns (b, c, h, w) gate (module semantics)."""
    b, c, h, w = x.shape
    gate = channel_gate_scores(x, w1, b1, w2, b2, gamma, beta, eps=eps)
    # Module semantics: y.view(b, c, 1, 1).expand_as(x). Pure broadcast, no
    # compute; when the consumer multiplies x by the gate, call
    # channel_gate_scores() directly so XLA fuses and avoids a full HBM write.
    return jnp.broadcast_to(gate[:, :, None, None], (b, c, h, w))


def channel_gate_ref(x, w1, b1, w2, b2, gamma, beta, eps=1e-5):
    """Pure-JAX reference for correctness check."""
    b, c, h, w = x.shape
    y = jnp.mean(x, axis=(2, 3))
    y = jnp.maximum(y @ w1.T + b1, 0.0)
    y = y @ w2.T + b2
    mu = jnp.mean(y, axis=0, keepdims=True)
    var = jnp.mean((y - mu) ** 2, axis=0, keepdims=True)
    y = (y - mu) / jnp.sqrt(var + eps) * gamma + beta
    return jnp.broadcast_to(y[:, :, None, None], (b, c, h, w))


if __name__ == "__main__":
    # Module config: channel=64, reduction=16 -> hidden=4.
    B, C, H, W = 2, 64, 16, 16
    R = 16
    HID = C // R

    key = jax.random.PRNGKey(0)
    kx, k1, k2, k3, k4 = jax.random.split(key, 5)

    x = jax.random.normal(kx, (B, C, H, W), dtype=jnp.float32)

    # Deterministic parameter init (PyTorch Linear weight layout: (out, in)).
    w1 = 0.1 * jax.random.normal(k1, (HID, C), dtype=jnp.float32)
    b1 = 0.1 * jax.random.normal(k2, (HID,), dtype=jnp.float32)
    w2 = 0.1 * jax.random.normal(k3, (C, HID), dtype=jnp.float32)
    b2 = 0.1 * jax.random.normal(k4, (C,), dtype=jnp.float32)
    # BatchNorm1d default affine init: gamma=1, beta=0.
    gamma = jnp.ones((C,), dtype=jnp.float32)
    beta = jnp.zeros((C,), dtype=jnp.float32)

    out = channel_gate(x, w1, b1, w2, b2, gamma, beta)
    out = jax.block_until_ready(out)

    ref = channel_gate_ref(x, w1, b1, w2, b2, gamma, beta)
    assert out.shape == (B, C, H, W)
    assert jnp.allclose(out, ref, atol=1e-4, rtol=1e-4), "mismatch vs reference"

    print("KERNEL_OK")
</pallas_src>

<mosaic_0001>
module attributes {stable_mosaic.version = 11 : i64} {
  func.func @_channel_gate_kernel(%arg0: i32, %arg1: memref<2x64x256xf32, #tpu.memory_space<vmem>>, %arg2: memref<64x4xf32, #tpu.memory_space<vmem>>, %arg3: memref<1x4xf32, #tpu.memory_space<vmem>>, %arg4: memref<4x64xf32, #tpu.memory_space<vmem>>, %arg5: memref<1x64xf32, #tpu.memory_space<vmem>>, %arg6: memref<1x64xf32, #tpu.memory_space<vmem>>, %arg7: memref<1x64xf32, #tpu.memory_space<vmem>>, %arg8: memref<2x64xf32, #tpu.memory_space<vmem>>, %arg9: memref<2x64x128xf32, #tpu.memory_space<vmem>>) attributes {dimension_semantics = [#tpu.dimension_semantics<arbitrary>], iteration_bounds = array<i64: 1>, scalar_prefetch = 0 : i64, scratch_operands = 1 : i64, tpu.core_type = #tpu.core_type<tc>, window_params = [{transform_indices = @transform_0, window_bounds = array<i64: 2, 64, 256>}, {pipeline_mode = #tpu.pipeline_mode<synchronous>, transform_indices = @transform_1, window_bounds = array<i64: 64, 4>}, {pipeline_mode = #tpu.pipeline_mode<synchronous>, transform_indices = @transform_2, window_bounds = array<i64: 1, 4>}, {pipeline_mode = #tpu.pipeline_mode<synchronous>, transform_indices = @transform_3, window_bounds = array<i64: 4, 64>}, {pipeline_mode = #tpu.pipeline_mode<synchronous>, transform_indices = @transform_4, window_bounds = array<i64: 1, 64>}, {pipeline_mode = #tpu.pipeline_mode<synchronous>, transform_indices = @transform_5, window_bounds = array<i64: 1, 64>}, {pipeline_mode = #tpu.pipeline_mode<synchronous>, transform_indices = @transform_6, window_bounds = array<i64: 1, 64>}, {pipeline_mode = #tpu.pipeline_mode<synchronous>, transform_indices = @transform_7, window_bounds = array<i64: 2, 64>}]} {
    %c0_i32 = arith.constant 0 : i32
    %0 = arith.cmpi eq, %arg0, %c0_i32 : i32
    %1 = arith.extui %0 : i1 to i32
    %c0_i32_0 = arith.constant 0 : i32
    %2 = arith.cmpi ne, %1, %c0_i32_0 : i32
    scf.if %2 {
      %cst = arith.constant 0.000000e+00 : f32
      %12 = vector.broadcast %cst : f32 to vector<2x64x128xf32>
      %c0_13 = arith.constant 0 : index
      %c0_14 = arith.constant 0 : index
      %c0_15 = arith.constant 0 : index
      %13 = vector.load %arg9[%c0_13, %c0_14, %c0_15] : memref<2x64x128xf32, #tpu.memory_space<vmem>>, vector<2x64x128xf32>
      tpu.vector_store %arg9[%c0_13, %c0_14, %c0_15], %12 {strides = array<i32>} : memref<2x64x128xf32, #tpu.memory_space<vmem>>, vector<2x64x128xf32>,
    } else {
    }
    %c0 = arith.constant 0 : index
    %c0_1 = arith.constant 0 : index
    %c0_2 = arith.constant 0 : index
    %3 = vector.load %arg1[%c0, %c0_1, %c0_2] : memref<2x64x256xf32, #tpu.memory_space<vmem>>, vector<2x64x128xf32>
    %c0_3 = arith.constant 0 : index
    %c0_4 = arith.constant 0 : index
    %c128 = arith.constant 128 : index
    %4 = vector.load %arg1[%c0_3, %c0_4, %c128] : memref<2x64x256xf32, #tpu.memory_space<vmem>>, vector<2x64x128xf32>
    %5 = arith.addf %3, %4 : vector<2x64x128xf32>
    %c0_5 = arith.constant 0 : index
    %c0_6 = arith.constant 0 : index
    %c0_7 = arith.constant 0 : index
    %6 = vector.load %arg9[%c0_5, %c0_6, %c0_7] : memref<2x64x128xf32, #tpu.memory_space<vmem>>, vector<2x64x128xf32>
    %7 = arith.addf %6, %5 : vector<2x64x128xf32>
    %c0_8 = arith.constant 0 : index
    %c0_9 = arith.constant 0 : index
    %c0_10 = arith.constant 0 : index
    %8 = vector.load %arg9[%c0_8, %c0_9, %c0_10] : memref<2x64x128xf32, #tpu.memory_space<vmem>>, vector<2x64x128xf32>
    tpu.vector_store %arg9[%c0_8, %c0_9, %c0_10], %7 {strides = array<i32>} : memref<2x64x128xf32, #tpu.memory_space<vmem>>, vector<2x64x128xf32>,
    %c0_i32_11 = arith.constant 0 : i32
    %9 = arith.cmpi eq, %arg0, %c0_i32_11 : i32
    %10 = arith.extui %9 : i1 to i32
    %c0_i32_12 = arith.constant 0 : i32
    %11 = arith.cmpi ne, %10, %c0_i32_12 : i32
    scf.if %11 {
      %c0_13 = arith.constant 0 : index
      %c0_14 = arith.constant 0 : index
      %c0_15 = arith.constant 0 : index
      %12 = vector.load %arg9[%c0_13, %c0_14, %c0_15] : memref<2x64x128xf32, #tpu.memory_space<vmem>>, vector<2x64x128xf32>
      %cst = arith.constant dense<0.000000e+00> : vector<2x64xf32>
      %13 = vector.multi_reduction <add>, %12, %cst [2] : vector<2x64x128xf32> to vector<2x64xf32>
      %cst_16 = arith.constant 3.906250e-03 : f32
      %14 = vector.broadcast %cst_16 : f32 to vector<2x64xf32>
      %15 = arith.mulf %13, %14 : vector<2x64xf32>
      %c0_17 = arith.constant 0 : index
      %c0_18 = arith.constant 0 : index
      %16 = vector.load %arg2[%c0_17, %c0_18] : memref<64x4xf32, #tpu.memory_space<vmem>>, vector<64x4xf32>
      %cst_19 = arith.constant dense<0.000000e+00> : vector<2x4xf32>
      %17 = tpu.matmul %15, %16, %cst_19 {dimension_numbers = #tpu.dot_dimension_numbers<[1], [0], [0], [1], [0, 0, 1, 1], [], []>} : vector<2x64xf32>, vector<64x4xf32>, vector<2x4xf32> -> vector<2x4xf32>
      %c0_20 = arith.constant 0 : index
      %c0_21 = arith.constant 0 : index
      %18 = vector.load %arg3[%c0_20, %c0_21] : memref<1x4xf32, #tpu.memory_space<vmem>>, vector<1x4xf32>
      %19 = vector.broadcast %18 : vector<1x4xf32> to vector<2x4xf32>
      %20 = arith.addf %17, %19 : vector<2x4xf32>
      %cst_22 = arith.constant 0.000000e+00 : f32
      %21 = vector.broadcast %cst_22 : f32 to vector<2x4xf32>
      %22 = arith.maximumf %20, %21 : vector<2x4xf32>
      %c0_23 = arith.constant 0 : index
      %c0_24 = arith.constant 0 : index
      %23 = vector.load %arg4[%c0_23, %c0_24] : memref<4x64xf32, #tpu.memory_space<vmem>>, vector<4x64xf32>
      %cst_25 = arith.constant dense<0.000000e+00> : vector<2x64xf32>
      %24 = tpu.matmul %22, %23, %cst_25 {dimension_numbers = #tpu.dot_dimension_numbers<[1], [0], [0], [1], [0, 0, 1, 1], [], []>} : vector<2x4xf32>, vector<4x64xf32>, vector<2x64xf32> -> vector<2x64xf32>
      %c0_26 = arith.constant 0 : index
      %c0_27 = arith.constant 0 : index
      %25 = vector.load %arg5[%c0_26, %c0_27] : memref<1x64xf32, #tpu.memory_space<vmem>>, vector<1x64xf32>
      %26 = vector.broadcast %25 : vector<1x64xf32> to vector<2x64xf32>
      %27 = arith.addf %24, %26 : vector<2x64xf32>
      %cst_28 = arith.constant dense<0.000000e+00> : vector<64xf32>
      %28 = vector.multi_reduction <add>, %27, %cst_28 [0] : vector<2x64xf32> to vector<64xf32>
      %29 = vector.shape_cast %28 : vector<64xf32> to vector<1x64xf32>
      %cst_29 = arith.constant 2.000000e+00 : f32
      %30 = vector.broadcast %cst_29 : f32 to vector<1x64xf32>
      %31 = arith.divf %29, %30 : vector<1x64xf32>
      %32 = vector.broadcast %31 : vector<1x64xf32> to vector<2x64xf32>
      %33 = arith.subf %27, %32 : vector<2x64xf32>
      %34 = vector.broadcast %31 : vector<1x64xf32> to vector<2x64xf32>
      %35 = arith.subf %27, %34 : vector<2x64xf32>
      %36 = arith.mulf %33, %35 : vector<2x64xf32>
      %cst_30 = arith.constant dense<0.000000e+00> : vector<64xf32>
      %37 = vector.multi_reduction <add>, %36, %cst_30 [0] : vector<2x64xf32> to vector<64xf32>
      %38 = vector.shape_cast %37 : vector<64xf32> to vector<1x64xf32>
      %cst_31 = arith.constant 2.000000e+00 : f32
      %39 = vector.broadcast %cst_31 : f32 to vector<1x64xf32>
      %40 = arith.divf %38, %39 : vector<1x64xf32>
      %41 = vector.broadcast %31 : vector<1x64xf32> to vector<2x64xf32>
      %42 = arith.subf %27, %41 : vector<2x64xf32>
      %cst_32 = arith.constant 9.99999974E-6 : f32
      %43 = vector.broadcast %cst_32 : f32 to vector<1x64xf32>
      %44 = arith.addf %40, %43 : vector<1x64xf32>
      %45 = math.rsqrt %44 : vector<1x64xf32>
      %46 = vector.broadcast %45 : vector<1x64xf32> to vector<2x64xf32>
      %47 = arith.mulf %42, %46 : vector<2x64xf32>
      %c0_33 = arith.constant 0 : index
      %c0_34 = arith.constant 0 : index
      %48 = vector.load %arg6[%c0_33, %c0_34] : memref<1x64xf32, #tpu.memory_space<vmem>>, vector<1x64xf32>
      %49 = vector.broadcast %48 : vector<1x64xf32> to vector<2x64xf32>
      %50 = arith.mulf %47, %49 : vector<2x64xf32>
      %c0_35 = arith.constant 0 : index
      %c0_36 = arith.constant 0 : index
      %51 = vector.load %arg7[%c0_35, %c0_36] : memref<1x64xf32, #tpu.memory_space<vmem>>, vector<1x64xf32>
      %52 = vector.broadcast %51 : vector<1x64xf32> to vector<2x64xf32>
      %53 = arith.addf %50, %52 : vector<2x64xf32>
      %c0_37 = arith.constant 0 : index
      %c0_38 = arith.constant 0 : index
      %54 = vector.load %arg8[%c0_37, %c0_38] : memref<2x64xf32, #tpu.memory_space<vmem>>, vector<2x64xf32>
      tpu.vector_store %arg8[%c0_37, %c0_38], %53 {strides = array<i32>} : memref<2x64xf32, #tpu.memory_space<vmem>>, vector<2x64xf32>,
    } else {
    }
    return
  }
  func.func @transform_0(%arg0: i32) -> (i32, i32, i32) {
    %c0_i32 = arith.constant 0 : i32
    %c0_i32_0 = arith.constant 0 : i32
    %c0_i32_1 = arith.constant 0 : i32
    return %c0_i32, %c0_i32_0, %arg0 : i32, i32, i32
  }
  func.func @transform_1(%arg0: i32) -> (i32, i32) {
    %c0_i32 = arith.constant 0 : i32
    %c0_i32_0 = arith.constant 0 : i32
    %c0_i32_1 = arith.constant 0 : i32
    return %c0_i32, %c0_i32_0 : i32, i32
  }
  func.func @transform_2(%arg0: i32) -> (i32, i32) {
    %c0_i32 = arith.constant 0 : i32
    %c0_i32_0 = arith.constant 0 : i32
    %c0_i32_1 = arith.constant 0 : i32
    return %c0_i32, %c0_i32_0 : i32, i32
  }
  func.func @transform_3(%arg0: i32) -> (i32, i32) {
    %c0_i32 = arith.constant 0 : i32
    %c0_i32_0 = arith.constant 0 : i32
    %c0_i32_1 = arith.constant 0 : i32
    return %c0_i32, %c0_i32_0 : i32, i32
  }
  func.func @transform_4(%arg0: i32) -> (i32, i32) {
    %c0_i32 = arith.constant 0 : i32
    %c0_i32_0 = arith.constant 0 : i32
    %c0_i32_1 = arith.constant 0 : i32
    return %c0_i32, %c0_i32_0 : i32, i32
  }
  func.func @transform_5(%arg0: i32) -> (i32, i32) {
    %c0_i32 = arith.constant 0 : i32
    %c0_i32_0 = arith.constant 0 : i32
    %c0_i32_1 = arith.constant 0 : i32
    return %c0_i32, %c0_i32_0 : i32, i32
  }
  func.func @transform_6(%arg0: i32) -> (i32, i32) {
    %c0_i32 = arith.constant 0 : i32
    %c0_i32_0 = arith.constant 0 : i32
    %c0_i32_1 = arith.constant 0 : i32
    return %c0_i32, %c0_i32_0 : i32, i32
  }
  func.func @transform_7(%arg0: i32) -> (i32, i32) {
    %c0_i32 = arith.constant 0 : i32
    %c0_i32_0 = arith.constant 0 : i32
    %c0_i32_1 = arith.constant 0 : i32
    return %c0_i32, %c0_i32_0 : i32, i32
  }
}

</mosaic_0001>

<bundles_post_ra>
// kernel: tpu_custom_call.1
= control target key start
LH: loop header
LB: loop body
LE: loop exit
PB: predicated region body
PF: predicated region fallthrough
CT: control target
= control target key end

     0   :  { %12 = vsyncpa [#allocation4], 0  ;;  %s766_s0 = inlined_call_operand.hbm [shape: f32[2,64,256], index: 0, kind: input, shape index: {}]   ;;  %s767_s1 = inlined_call_operand.vmem [shape: f32[64,4], index: 1, kind: input, shape index: {}]   ;;  %s768_s2 = inlined_call_operand.vmem [shape: f32[1,4], index: 2, kind: input, shape index: {}]   ;;  %s769_s3 = inlined_call_operand.vmem [shape: f32[4,64], index: 3, kind: input, shape index: {}]   ;;  %s770_s4 = inlined_call_operand.vmem [shape: f32[1,64], index: 4, kind: input, shape index: {}]   ;;  %s771_s5 = inlined_call_operand.vmem [shape: f32[1,64], index: 5, kind: input, shape index: {}]   ;;  %s772_s6 = inlined_call_operand.vmem [shape: f32[1,64], index: 6, kind: input, shape index: {}]   ;;  %s773_s7 = inlined_call_operand.hbm [shape: f32[2,64], index: 7, kind: output, shape index: {}]  }
   0x1   :  { %13 = vsyncpa [#allocation5], 0  ;;  %s660_s24 = smov [#allocation3]  }
   0x2   :  { %s19_s25 = sshll.u32 %s660_s24, 4  ;;  %s20_s25 = int_to_ptr.vmem [resolvable:$true] %s19_s25 }
   0x3   :  { %s624_s26 = scalar_lea.vmem %s20_s25, 4096  ;;  %p629_p1 = scmp.lt.s32.totalorder %s20_s25, %s20_s25 }
   0x4   :  { %p625_p0 = scmp.ne.s32.totalorder %s20_s25, %s624_s26  ;;  %p630_p2 = scmp.lt.s32.totalorder %s624_s26, %s624_s26 }
   0x6   :  { %p631_p3 = por %p630_p2, %p629_p1 }
   0x8   :  { %p632_p4 = pnand %p631_p3, %p625_p0 }
   0xa   :  { %635 = shalt.err (!%p632_p4)
}
   0xb   :  { %s661_s27 = smov 256   ;;  %s662_s28 = smov 16  }
   0xc   :  { %25 = dma.hbm_to_vmem [thread:$0]  %s766_s0, 4096, %s20_s25, [#allocation4], %s661_s27, %s661_s27, %s662_s28  }
   0xd   :  { %656 = dma.done.wait [#allocation4], 4096  }
   0xe   :  { %657 = vsyncadd [#allocation4], 4294963200  ;;  %v69_v0 = vld [vmem:[#allocation3 + $0x80] sm:$0xff]  ;;  %v85_v1 = vld [vmem:[#allocation3 + $0x88] sm:$0xff]  ;;  %v663_v48 = vmov 0.0   ;;  %vm664_vm0 = vmmov 0   ;;  %v255_v61 = vlaneseq }
   0xf   :  { %v61_v2 = vld [vmem:[#allocation3] sm:$0xff]  ;;  %v101_v3 = vadd.f32 %v85_v1, %v69_v0  ;;  %v77_v4 = vld [vmem:[#allocation3 + $0x8] sm:$0xff]  ;;  %v70_v5 = vld [vmem:[#allocation3 + $0x90] sm:$0xff]  ;;  %584 = vmatprep.subr.mxu0 %v663_v48  ;;  %603 = vmatprep.subr.mxu1 %v663_v48  ;;  %vm266_vm1 = vcmask 130112   ;;  %vm273_vm2 = vcmask 195712   ;;  %vm280_vm3 = vcmask 261312  }
  0x10   :  { %v86_v6 = vld [vmem:[#allocation3 + $0x98] sm:$0xff]  ;;  %v93_v7 = vadd.f32 %v77_v4, %v61_v2  ;;  %v62_v8 = vld [vmem:[#allocation3 + $0x10] sm:$0xff]  ;;  %v71_v12 = vld [vmem:[#allocation3 + $0xa0] sm:$0xff]  ;;  %600 = vmatprep.mubr.msk.f32.mxu0 %vm664_vm0, %v663_v48  ;;  %605 = vmatprep.mubr.msk.f32.mxu1 %vm664_vm0, %v663_v48  ;;  %v256_v0 = vand.u32 127, %v255_v61  ;;  %v258_v2 = vshrl.u32 %v255_v61, 7  ;;  %vm287_vm4 = vcmask 326912  }
  0x11   :  { %v78_v9 = vld [vmem:[#allocation3 + $0x18] sm:$0xff]  ;;  %192 = vadd.xlane.f32.xlu1 %v101_v3  ;;  %v102_v10 = vadd.f32 %v86_v6, %v70_v5  ;;  %v87_v13 = vld [vmem:[#allocation3 + $0xa8] sm:$0xff]  ;;  %v63_v14 = vld [vmem:[#allocation3 + $0x20] sm:$0xff]  ;;  %vm294_vm5 = vcmask 392512   ;;  %vm301_vm6 = vcmask 458112   ;;  %vm308_vm7 = vcmask 523712  }
  0x12   :  { %176 = vadd.xlane.f32.xlu0 %v93_v7  ;;  %v94_v11 = vadd.f32 %v78_v9, %v62_v8  ;;  %v79_v15 = vld [vmem:[#allocation3 + $0x28] sm:$0xff]  ;;  %v103_v16 = vadd.f32 %v87_v13, %v71_v12  ;;  %v72_v18 = vld [vmem:[#allocation3 + $0xb0] sm:$0xff]  ;;  %v88_v19 = vld [vmem:[#allocation3 + $0xb8] sm:$0xff]  ;;  %v261_v4 = vadd.s32 4294967288, %v256_v0  ;;  %v268_v5 = vadd.s32 4294967280, %v256_v0  ;;  %s665_s29 = smov [#allocation6]  }
  0x13   :  { %v95_v17 = vadd.f32 %v79_v15, %v63_v14  ;;  %v64_v20 = vld [vmem:[#allocation3 + $0x30] sm:$0xff]  ;;  %v80_v21 = vld [vmem:[#allocation3 + $0x38] sm:$0xff]  ;;  %v104_v22 = vadd.f32 %v88_v19, %v72_v18  ;;  %v73_v24 = vld [vmem:[#allocation3 + $0xc0] sm:$0xff]  ;;  %v275_v6 = vadd.s32 4294967272, %v256_v0  ;;  %v282_v7 = vadd.s32 4294967264, %v256_v0  ;;  %s557_s30 = sshll.u32 %s665_s29, 4  ;;  %s558_s30 = int_to_ptr.vmem [resolvable:$true] %s557_s30 }
  0x14   :  { %v96_v23 = vadd.f32 %v80_v21, %v64_v20  ;;  %v89_v25 = vld [vmem:[#allocation3 + $0xc8] sm:$0xff]  ;;  %v65_v26 = vld [vmem:[#allocation3 + $0x40] sm:$0xff]  ;;  %v74_v30 = vld [vmem:[#allocation3 + $0xd0] sm:$0xff]  ;;  %v289_v9 = vadd.s32 4294967256, %v256_v0  ;;  %v264_v12 = vsub.s32 %v261_v4, %v258_v2  ;;  %v271_v13 = vsub.s32 %v268_v5, %v258_v2  ;;  %s636_s0 = scalar_lea.vmem %s558_s30, 32  ;;  %p641_p6 = scmp.lt.s32.totalorder %s558_s30, %s558_s30 }
  0x15   :  { %194 = vadd.xlane.f32.xlu1 %v102_v10  ;;  %v81_v27 = vld [vmem:[#allocation3 + $0x48] sm:$0xff]  ;;  %v105_v28 = vadd.f32 %v89_v25, %v73_v24  ;;  %v90_v31 = vld [vmem:[#allocation3 + $0xd8] sm:$0xff]  ;;  %v66_v32 = vld [vmem:[#allocation3 + $0x50] sm:$0xff]  ;;  %v259_v10 = vsub.s32 %v256_v0, %v258_v2  ;;  %v296_v14 = vadd.s32 4294967248, %v256_v0  ;;  %vm349_vm8 = vcmask 1041409   ;;  %p637_p5 = scmp.ne.s32.totalorder %s558_s30, %s636_s0  ;;  %p642_p7 = scmp.lt.s32.totalorder %s636_s0, %s636_s0 }
  0x16   :  { %178 = vadd.xlane.f32.xlu0 %v94_v11  ;;  %v97_v29 = vadd.f32 %v81_v27, %v65_v26  ;;  %v82_v33 = vld [vmem:[#allocation3 + $0x58] sm:$0xff]  ;;  %v106_v34 = vadd.f32 %v90_v31, %v74_v30  ;;  %v75_v36 = vld [vmem:[#allocation3 + $0xe0] sm:$0xff]  ;;  %v91_v37 = vld [vmem:[#allocation3 + $0xe8] sm:$0xff]  ;;  %v292_v20 = vsub.s32 %v289_v9, %v258_v2  ;;  %vm351_vm9 = vcmask 523264  }
  0x17   :  { %v98_v35 = vadd.f32 %v82_v33, %v66_v32  ;;  %v67_v38 = vld [vmem:[#allocation3 + $0x60] sm:$0xff]  ;;  %v83_v39 = vld [vmem:[#allocation3 + $0x68] sm:$0xff]  ;;  %v107_v40 = vadd.f32 %v91_v37, %v75_v36  ;;  %v76_v42 = vld [vmem:[#allocation3 + $0xf0] sm:$0xff]  ;;  %v303_v33 = vadd.s32 4294967240, %v256_v0  ;;  %vm437_vm10 = vcmask 1043456   ;;  %p643_p8 = por %p642_p7, %p641_p6 }
  0x18   :  { %v99_v41 = vadd.f32 %v83_v39, %v67_v38  ;;  %v92_v43 = vld [vmem:[#allocation3 + $0xf8] sm:$0xff]  ;;  %v68_v44 = vld [vmem:[#allocation3 + $0x70] sm:$0xff]  ;;  %v229_v51 = vld [vmem:[%s767_s1 + $0x28] sm:$0xff]  ;;  %vm433_vm11 = vcmask 31744   ;;  %vm511_vm12 = vcmask 517120  }
  0x19   :  { %196 = vadd.xlane.f32.xlu1 %v103_v16  ;;  %v84_v45 = vld [vmem:[#allocation3 + $0x78] sm:$0xff]  ;;  %v108_v46 = vadd.f32 %v92_v43, %v76_v42  ;;  %v230_v50 = vld [vmem:[%s767_s1 + $0x30] sm:$0xff]  ;;  %v228_v52 = vld [vmem:[%s767_s1 + $0x20] sm:$0xff]  ;;  %v278_v16 = vsub.s32 %v275_v6, %v258_v2  ;;  %p644_p9 = pnand %p643_p8, %p637_p5 }
  0x1a   :  { %180 = vadd.xlane.f32.xlu0 %v95_v17  ;;  %v100_v47 = vadd.f32 %v84_v45, %v68_v44  ;;  %v231_v49 = vld [vmem:[%s767_s1 + $0x38] sm:$0xff]  ;;  %v226_v54 = vld [vmem:[%s767_s1 + $0x10] sm:$0xff]  ;;  %v225_v55 = vld [vmem:[%s767_s1 + $0x8] sm:$0xff]  ;;  %v285_v17 = vsub.s32 %v282_v7, %v258_v2 }
  0x1b   :  { %585 = vmatpush3.msra.mxu0 %v231_v49  ;;  %v227_v53 = vld [vmem:[%s767_s1 + $0x18] sm:$0xff]  ;;  %v224_v56 = vld [vmem:[%s767_s1] sm:$0xff] }
  0x1c   :  { %586 = vmatprep.subr.mxu0 %v663_v48 }
  0x1d   :  { %198 = vadd.xlane.f32.xlu1 %v104_v22  ;;  %587 = vmatpush3.msra.mxu0 %v230_v50  ;;  %v306_v50 = vsub.s32 %v303_v33, %v258_v2 }
  0x1e   :  { %182 = vadd.xlane.f32.xlu0 %v96_v23  ;;  %588 = vmatprep.subr.mxu0 %v663_v48 }
  0x1f   :  { %589 = vmatpush3.msra.mxu0 %v229_v51 }
  0x20   :  { %590 = vmatprep.subr.mxu0 %v663_v48 }
  0x21   :  { %200 = vadd.xlane.f32.xlu1 %v105_v28  ;;  %591 = vmatpush3.msra.mxu0 %v228_v52 }
  0x22   :  { %184 = vadd.xlane.f32.xlu0 %v97_v29  ;;  %592 = vmatprep.subr.mxu0 %v663_v48  ;;  %v299_v29 = vsub.s32 %v296_v14, %v258_v2 }
  0x23   :  { %593 = vmatpush3.msra.mxu0 %v227_v53 }
  0x24   :  { %594 = vmatprep.subr.mxu0 %v663_v48 }
  0x25   :  { %202 = vadd.xlane.f32.xlu1 %v106_v34  ;;  %595 = vmatpush3.msra.mxu0 %v226_v54 }
  0x26   :  { %186 = vadd.xlane.f32.xlu0 %v98_v35  ;;  %596 = vmatprep.subr.mxu0 %v663_v48 }
  0x27   :  { %597 = vmatpush3.msra.mxu0 %v225_v55 }
  0x28   :  { %598 = vmatprep.subr.mxu0 %v663_v48 }
  0x29   :  { %204 = vadd.xlane.f32.xlu1 %v107_v40  ;;  %599 = vmatpush3.msra.mxu0 %v224_v56 }
  0x2a   :  { %188 = vadd.xlane.f32.xlu0 %v99_v41 }
  0x2d   :  { %206 = vadd.xlane.f32.xlu1 %v108_v46 }
  0x2e   :  { %190 = vadd.xlane.f32.xlu0 %v100_v47 }
  0x9a   :  { %v193_v57 = vpop.xlane.xlu1 %192 }
  0x9b   :  { %v177_v58 = vpop.xlane.xlu0 %176  ;;  %v216_v22 = vmul.f32 0.00390625, %v193_v57 }
  0x9c   :  { %v208_v26 = vmul.f32 0.00390625, %v177_v58 }
  0x9d   :  { %v313_v38 = vrot.slane %v216_v22, %v259_v10 }
  0x9e   :  { %v195_v59 = vpop.xlane.xlu1 %194  ;;  %v260_v43 = vrot.slane %v208_v26, %v259_v10  ;;  %v425_v10 = vld [vmem:[%s769_s3] sm:$0xf] }
  0x9f   :  { %v179_v60 = vpop.xlane.xlu0 %178  ;;  %v217_v15 = vmul.f32 0.00390625, %v195_v59  ;;  %604 = vmatpush3.msk.msra.mxu1 %vm437_vm10, %v425_v10 }
  0xa0   :  { %v209_v18 = vmul.f32 0.00390625, %v179_v60 }
  0xa1   :  { %v317_v30 = vrot.slane %v217_v15, %v264_v12 }
  0xa2   :  { %v197_v62 = vpop.xlane.xlu1 %196  ;;  %v265_v34 = vrot.slane %v209_v18, %v264_v12 }
  0xa3   :  { %v181_v63 = vpop.xlane.xlu0 %180  ;;  %v218_v19 = vmul.f32 0.00390625, %v197_v62  ;;  %v318_v47 = vsel %vm266_vm1, %v317_v30, %v313_v38 }
  0xa4   :  { %v210_v23 = vmul.f32 0.00390625, %v181_v63  ;;  %v267_v51 = vsel %vm266_vm1, %v265_v34, %v260_v43 }
  0xa5   :  { %v322_v35 = vrot.slane %v218_v19, %v271_v13 }
  0xa6   :  { %v199_v1 = vpop.xlane.xlu1 %198  ;;  %v272_v39 = vrot.slane %v210_v23, %v271_v13 }
  0xa7   :  { %v183_v3 = vpop.xlane.xlu0 %182  ;;  %v219_v24 = vmul.f32 0.00390625, %v199_v1  ;;  %v323_v52 = vsel %vm273_vm2, %v322_v35, %v318_v47 }
  0xa8   :  { %v211_v27 = vmul.f32 0.00390625, %v183_v3  ;;  %v274_v56 = vsel %vm273_vm2, %v272_v39, %v267_v51 }
  0xa9   :  { %v327_v40 = vrot.slane %v219_v24, %v278_v16 }
  0xaa   :  { %v201_v8 = vpop.xlane.xlu1 %200  ;;  %v279_v44 = vrot.slane %v211_v27, %v278_v16  ;;  %v568_v16 = vld [vmem:[%s770_s4] ss:$0 sm:$0xff] }
  0xab   :  { %v185_v11 = vpop.xlane.xlu0 %184  ;;  %v220_v28 = vmul.f32 0.00390625, %v201_v8  ;;  %v328_v57 = vsel %vm280_vm3, %v327_v40, %v323_v52  ;;  %v571_v40 = vld [vmem:[%s771_s5] ss:$0 sm:$0xff] }
  0xac   :  { %v212_v31 = vmul.f32 0.00390625, %v185_v11  ;;  %v281_v61 = vsel %vm280_vm3, %v279_v44, %v274_v56  ;;  %v566_v11 = vld [vmem:[%s768_s2] ss:$0 sm:$0xff] }
  0xad   :  { %v332_v45 = vrot.slane %v220_v28, %v285_v17 }
  0xae   :  { %v203_v21 = vpop.xlane.xlu1 %202  ;;  %v286_v48 = vrot.slane %v212_v31, %v285_v17 }
  0xaf   :  { %v187_v25 = vpop.xlane.xlu0 %186  ;;  %v221_v32 = vmul.f32 0.00390625, %v203_v21  ;;  %v333_v62 = vsel %vm287_vm4, %v332_v45, %v328_v57 }
  0xb0   :  { %v213_v36 = vmul.f32 0.00390625, %v187_v25  ;;  %v288_v0 = vsel %vm287_vm4, %v286_v48, %v281_v61 }
  0xb1   :  { %v337_v49 = vrot.slane %v221_v32, %v292_v20 }
  0xb2   :  { %v205_v37 = vpop.xlane.xlu1 %204  ;;  %v293_v53 = vrot.slane %v213_v36, %v292_v20 }
  0xb3   :  { %v222_v41 = vmul.f32 0.00390625, %v205_v37  ;;  %v189_v42 = vpop.xlane.xlu0 %188  ;;  %v338_v1 = vsel %vm294_vm5, %v337_v49, %v333_v62 }
  0xb4   :  { %v214_v46 = vmul.f32 0.00390625, %v189_v42  ;;  %v295_v3 = vsel %vm294_vm5, %v293_v53, %v288_v0  ;;  %v572_v42 = vld [vmem:[%s772_s6] ss:$0 sm:$0xff] }
  0xb5   :  { %v342_v54 = vrot.slane %v222_v41, %v299_v29 }
  0xb6   :  { %v207_v55 = vpop.xlane.xlu1 %206  ;;  %v300_v58 = vrot.slane %v214_v46, %v299_v29 }
  0xb7   :  { %v223_v59 = vmul.f32 0.00390625, %v207_v55  ;;  %v191_v60 = vpop.xlane.xlu0 %190  ;;  %v343_v4 = vsel %vm301_vm6, %v342_v54, %v338_v1 }
  0xb8   :  { %v215_v63 = vmul.f32 0.00390625, %v191_v60  ;;  %v302_v6 = vsel %vm301_vm6, %v300_v58, %v295_v3 }
  0xb9   :  { %v347_v2 = vrot.slane %v223_v59, %v306_v50 }
  0xba   :  { %v307_v5 = vrot.slane %v215_v63, %v306_v50 }
  0xbb   :  { %v348_v7 = vsel %vm308_vm7, %v347_v2, %v343_v4 }
  0xbc   :  { %v309_v8 = vsel %vm308_vm7, %v307_v5, %v302_v6 }
  0xbd   :  { %v350_v9 = vsel %vm349_vm8, %v348_v7, %v309_v8 }
  0xbe   :  { %601 = vmatmul.mubr.msk.f32.vlgmr.msra.gmra.mxu0 %vm351_vm9, %v350_v9 }
 0x17e   :  { %v420_v12 = vpop.f32.mrf.mxu0 }
 0x17f   :  { %v421_v13 = vadd.f32 %v566_v11, %v420_v12 }
 0x180   :  { %v602_v14 = vpop.f32.mrf.mxu0 }
 0x181   :  { %v424_v15 = vmax.f32 %v421_v13, 0.0 }
 0x183   :  { %606 = vmatmul.mubr.msk.f32.vlgmr.msra.gmra.mxu1 %vm433_vm11, %v424_v15 }
 0x243   :  { %v507_v17 = vpop.f32.mrf.mxu1 }
 0x244   :  { %v508_v18 = vadd.f32 %v568_v16, %v507_v17 }
 0x245   :  { %v607_v19 = vpop.f32.mrf.mxu1 }
 0x246   :  { %v512_v20 = vsel %vm511_vm12, %v508_v18, 0.0 }
 0x247   :  { %v513_v21 = vrot.slane %v512_v20, 4 }
 0x249   :  { %v514_v22 = vadd.f32 %v513_v21, %v512_v20 }
 0x24b   :  { %v515_v23 = vrot.slane %v514_v22, 2 }
 0x24d   :  { %v516_v24 = vadd.f32 %v515_v23, %v514_v22 }
 0x24f   :  { %v517_v25 = vrot.slane %v516_v24, 1 }
 0x251   :  { %v518_v26 = vadd.f32 %v517_v25, %v516_v24 }
 0x253   :  { %v520_v27 = vmul.f32 0.5, %v518_v26 }
 0x255   :  { %v521_v28 = vsub.f32 %v508_v18, %v520_v27 }
 0x257   :  { %v522_v29 = vmul.f32 %v521_v28, %v521_v28 }
 0x259   :  { %v523_v30 = vsel %vm511_vm12, %v522_v29, 0.0 }
 0x25a   :  { %v524_v31 = vrot.slane %v523_v30, 4 }
 0x25c   :  { %v525_v32 = vadd.f32 %v524_v31, %v523_v30 }
 0x25e   :  { %v526_v33 = vrot.slane %v525_v32, 2 }
 0x260   :  { %v527_v34 = vadd.f32 %v526_v33, %v525_v32 }
 0x262   :  { %v528_v35 = vrot.slane %v527_v34, 1 }
 0x264   :  { %v529_v36 = vadd.f32 %v528_v35, %v527_v34 }
 0x266   :  { %v530_v37 = vmul.f32 0.5, %v529_v36 }
 0x268   :  { %v531_v38 = vadd.f32 1e-05, %v530_v37 }
 0x26a   :  { %614 = vrsqrt.f32 %v531_v38 }
 0x277   :  { %v615_v39 = vpop.eup %614 }
 0x278   :  { %v533_v41 = vmul.f32 %v615_v39, %v521_v28 }
 0x27a   :  { %v541_v43 = vmul.f32 %v571_v40, %v533_v41 }
 0x27c   :  { %v549_v44 = vadd.f32 %v572_v42, %v541_v43 }
 0x27e   :  { %550 = vst.msk [vmem:[#allocation6] sm:$0x3] %vm511_vm12, %v549_v44 }
 0x27f   :  { %647 = shalt.err (!%p644_p9)
}
 0x280   :  { %560 = dma.vmem_to_hbm [thread:$0]  %s558_s30, 32, %s773_s7, [#allocation5]  }
 0x281   :  { %658 = dma.done.wait [#allocation5], 32  }
 0x282   :  { %659 = vsyncadd [#allocation5], 4294967264 }
 0x283   :  { %564 = vsyncpa [#allocation4], 1 }
 0x284   :  { %565 = vsyncpa [#allocation5], 1 }

</bundles_post_ra>
